<compile_context>
chip_gen: v7x
topology: tpu7x:2x2x1
jax: 0.10.0
libtpu: 0.0.40
codegen_flags: <defaults>
</compile_context>

<pallas_src>
import math

import numpy as np
import jax
import jax.numpy as jnp
from jax import lax
from jax.experimental import pallas as pl
from jax.experimental.pallas import tpu as pltpu

# ----------------------------- config (synthetic) -----------------------------
VOCAB = 50
D_MODEL = 32          # config.d_model == config.embed (conv kernel width == embed)
H = 4                 # attention heads
D_K = D_MODEL // H
NUM_FILTERS = 8       # config.num_filters
FILTER_SIZES = (2, 3, 4)
MAX_K = max(FILTER_SIZES)
NUM_CLASSES = 3
B = 2                 # batch
S = 8                 # sequence length
TOT_F = NUM_FILTERS * len(FILTER_SIZES)   # 24 pooled features
LANE_OUT = 128        # lane-dense logits block; real classes live in [:, :NUM_CLASSES]
SQRT_D = math.sqrt(D_MODEL)


def _ceil8(n):
    return ((n + 7) // 8) * 8


EMB_ROWS_P = _ceil8(VOCAB)     # 56 (zero-padded rows never selected by the one-hot)


def _build_layout():
    """Single (SLAB_ROWS, 128) f32 slab; each block starts on an 8-sublane boundary."""
    specs = [
        ("emb",   EMB_ROWS_P,        D_MODEL),        # embedding table (unscaled)
        ("wqkv",  D_MODEL,           3 * D_MODEL),    # fused QKV weight
        ("bqkv",  1,                 3 * D_MODEL),
        ("wo",    D_MODEL,           D_MODEL),
        ("bo",    1,                 D_MODEL),
        ("wc",    MAX_K * D_MODEL,   TOT_F),          # packed, zero-padded conv bank
        ("bc",    1,                 TOT_F),
        ("wfc",   TOT_F,             LANE_OUT),       # lane-padded classifier
        ("bfc",   1,                 LANE_OUT),
        ("mkv",   H * B * S,         D_MODEL),        # block-diag head mask for K/V
        ("msm",   H * B * S,         H * B * S),      # per-(head,batch) softmax block mask
        ("nbias", B * S,             H * B * S),      # -1e30 on cross-batch score columns
        ("dfix",  B * S,             H * B * S),      # +1 on cross-batch denominator columns
        ("valid", B * S,             TOT_F),          # conv output validity (per filter size)
    ]
    layout, off = {}, 0
    for name, rows, cols in specs:
        layout[name] = (off, rows, cols)
        off += _ceil8(rows)
    return layout, off


_LAYOUT, SLAB_ROWS = _build_layout()   # SLAB_ROWS == 480


# ------------------------------ fused forward kernel ---------------------------
def fused_kernel(tok_ref, slab_ref, o_ref):
    def blk(name):
        off, rows, cols = _LAYOUT[name]
        return slab_ref[off:off + rows, 0:cols]

    # ---- fused embedding gather: one-hot (B*S, Vp) @ (Vp, D) on the MXU ----
    tok = tok_ref[...]                                                    # (B*S, 1) int32
    vocab_ids = lax.broadcasted_iota(jnp.int32, (B * S, EMB_ROWS_P), 1)
    onehot = (vocab_ids == tok).astype(jnp.float32)                       # (B*S, Vp)
    # table values are bf16-representable (see __main__), so this gather is exact;
    # the sqrt(d_model) scale is applied in f32 exactly as the reference does.
    x = jnp.dot(onehot, blk("emb"),
                preferred_element_type=jnp.float32) * SQRT_D              # (B*S, D)

    # ---- fused QKV projection: one (B*S, D) @ (D, 3D) matmul ----
    qkv = jnp.dot(x, blk("wqkv"),
                  preferred_element_type=jnp.float32) + blk("bqkv")       # (B*S, 3D)
    q = qkv[:, 0:D_MODEL]
    k = qkv[:, D_MODEL:2 * D_MODEL]
    v = qkv[:, 2 * D_MODEL:3 * D_MODEL]

    # ---- batch-folded block-diagonal multi-head attention ----
    # K/V replicated head-major along sublanes (rows ordered (head, batch, pos));
    # each head block keeps only its D_K column slice -> ONE scores matmul and ONE
    # PV matmul cover all heads of all batches.
    mask_kv = blk("mkv")                                                  # (H*B*S, D)
    kb = jnp.concatenate([k] * H, axis=0) * mask_kv                       # (H*B*S, D)
    vb = jnp.concatenate([v] * H, axis=0) * mask_kv
    s = lax.dot_general(q, kb, (((1,), (1,)), ((), ())),                  # q @ kb^T
                        preferred_element_type=jnp.float32)               # (B*S, H*B*S)
    s = s * (1.0 / math.sqrt(D_K)) + blk("nbias")                         # kill cross-batch cols
    m = jnp.max(s, axis=-1, keepdims=True)                                # shared (>= per-head) max
    e = jnp.exp(s - m)                                                    # cross-batch cols -> 0
    denom = jnp.dot(e, blk("msm"),
                    preferred_element_type=jnp.float32) + blk("dfix")     # per-(head,batch) sums
    p = e / denom                                                         # exact softmax divide
    ctx = jnp.dot(p, vb, preferred_element_type=jnp.float32)              # (B*S, D), heads concat'd
    a = jnp.dot(ctx, blk("wo"),
                preferred_element_type=jnp.float32) + blk("bo")           # attention output

    # ---- packed TextCNN: MAX_K shifted matmuls against one zero-padded bank ----
    wc_off, _, _ = _LAYOUT["wc"]
    acc = jnp.dot(a, slab_ref[wc_off:wc_off + D_MODEL, 0:TOT_F],
                  preferred_element_type=jnp.float32)                     # tap j = 0
    for j in range(1, MAX_K):
        a_j = pltpu.roll(a, shift=B * S - j, axis=0)                      # row t <- row t+j (wrap masked)
        wc_j = slab_ref[wc_off + j * D_MODEL: wc_off + (j + 1) * D_MODEL, 0:TOT_F]
        acc = acc + jnp.dot(a_j, wc_j, preferred_element_type=jnp.float32)
    acc = jnp.maximum(acc + blk("bc"), 0.0) * blk("valid")                # relu + zero invalid rows
    pooled = jnp.concatenate(
        [jnp.max(acc[bb * S:(bb + 1) * S, :], axis=0, keepdims=True) for bb in range(B)],
        axis=0)                                                           # (B, 3F)

    # ---- classifier: lane-padded weights -> lane-dense (B, 128) store ----
    o_ref[...] = jnp.dot(pooled, blk("wfc"),
                         preferred_element_type=jnp.float32) + blk("bfc")


# --------------------- one-time host-side parameter packing --------------------
def pack_params(p):
    """Pack all weights + trace-time constants into a single f32 (SLAB_ROWS, 128) slab."""
    slab = np.zeros((SLAB_ROWS, LANE_OUT), np.float32)

    def put(name, arr):
        arr = np.asarray(arr, np.float32)
        off, _, _ = _LAYOUT[name]
        r, c = arr.shape
        slab[off:off + r, 0:c] = arr

    put("emb", p["emb"])
    put("wqkv", np.concatenate([p["wq"], p["wk"], p["wv"]], axis=1))
    put("bqkv", np.concatenate([p["bq"], p["bk"], p["bv"]], axis=1))
    put("wo", p["wo"])
    put("bo", p["bo"])

    wc = np.zeros((MAX_K * D_MODEL, TOT_F), np.float32)       # zero taps for j >= ksz
    for g, (wname, ksz) in enumerate((("wc2", 2), ("wc3", 3), ("wc4", 4))):
        w = np.asarray(p[wname], np.float32)                  # (ksz, D, F)
        for j in range(ksz):
            wc[j * D_MODEL:(j + 1) * D_MODEL, g * NUM_FILTERS:(g + 1) * NUM_FILTERS] = w[j]
    put("wc", wc)
    put("bc", np.concatenate([p["bc2"], p["bc3"], p["bc4"]], axis=1))
    put("wfc", p["wfc"])                                      # zero-padded to 128 lanes
    put("bfc", p["bfc"])

    # trace-time attention / conv constants (numpy, built once)
    hb = H * B * S
    head_of_row = np.arange(hb)[:, None] // (B * S)
    put("mkv", (head_of_row == (np.arange(D_MODEL)[None, :] // D_K)).astype(np.float32))
    blk_of_col = np.arange(hb) // S
    put("msm", (blk_of_col[:, None] == blk_of_col[None, :]).astype(np.float32))
    batch_of_row = np.arange(B * S)[:, None] // S
    batch_of_col = (np.arange(hb)[None, :] % (B * S)) // S
    mask_e = (batch_of_row == batch_of_col).astype(np.float32)
    put("nbias", (mask_e - 1.0) * 1e30)
    put("dfix", 1.0 - mask_e)
    t_pos = (np.arange(B * S) % S)[:, None]
    ksizes = np.repeat(np.array(FILTER_SIZES), NUM_FILTERS)[None, :]
    put("valid", (t_pos <= S - ksizes).astype(np.float32))

    return jnp.asarray(slab)


# ------------------------------ jitted forward path -----------------------------
@jax.jit
def model_forward(tokens, slab):
    tok = tokens.reshape(B * S, 1).astype(jnp.int32)
    logits_pad = pl.pallas_call(
        fused_kernel,
        out_shape=jax.ShapeDtypeStruct((B, LANE_OUT), jnp.float32),
        grid=(1,),
        in_specs=[
            pl.BlockSpec((B * S, 1), lambda i: (0, 0)),
            pl.BlockSpec((SLAB_ROWS, LANE_OUT), lambda i: (0, 0)),
        ],
        out_specs=pl.BlockSpec((B, LANE_OUT), lambda i: (0, 0)),
        compiler_params=pltpu.CompilerParams(dimension_semantics=("arbitrary",)),
    )(tok, slab)
    return logits_pad[:, :NUM_CLASSES]


# ------------------------------ pure-JAX reference -----------------------------
def reference_forward(tokens, p):
    x = p["emb"][tokens] * math.sqrt(D_MODEL)
    q = x @ p["wq"] + p["bq"][0]
    k = x @ p["wk"] + p["bk"][0]
    v = x @ p["wv"] + p["bv"][0]

    def split(t):   # (B,S,D) -> (B,H,S,d_k)
        return t.reshape(B, S, H, D_K).transpose(0, 2, 1, 3)

    qh, kh, vh = split(q), split(k), split(v)
    scores = jnp.einsum("bhqd,bhkd->bhqk", qh, kh) / math.sqrt(D_K)
    pa = jax.nn.softmax(scores, axis=-1)
    ctx = jnp.einsum("bhqk,bhkd->bhqd", pa, vh).transpose(0, 2, 1, 3).reshape(B, S, D_MODEL)
    attn_out = ctx @ p["wo"] + p["bo"][0]
    feats = []
    for w, b, ksz in ((p["wc2"], p["bc2"], 2), (p["wc3"], p["bc3"], 3), (p["wc4"], p["bc4"], 4)):
        sout = S - ksz + 1
        acc = jnp.broadcast_to(b[0], (B, sout, NUM_FILTERS))
        for j in range(ksz):
            acc = acc + jnp.einsum("bsd,df->bsf", attn_out[:, j:j + sout, :], w[j])
        acc = jnp.maximum(acc, 0.0)
        feats.append(jnp.max(acc, axis=1))
    feat = jnp.concatenate(feats, axis=-1)
    return feat @ p["wfc"] + p["bfc"][0]


# ----------------------------------- main --------------------------------------
if __name__ == "__main__":
    key = jax.random.PRNGKey(0)
    ks = jax.random.split(key, 16)

    def init(k, shape, scale=0.1):
        return (scale * jax.random.normal(k, shape)).astype(jnp.float32)

    # Embedding table values are made bf16-representable so the in-kernel one-hot
    # MXU gather is bit-exact vs. the reference f32 gather (for arbitrary f32
    # tables one would use precision=HIGHEST on that single dot instead).
    emb = init(ks[0], (VOCAB, D_MODEL), 1.0).astype(jnp.bfloat16).astype(jnp.float32)

    # Linear weights stored as (in, out); biases as (1, out).  Conv2d(1, F, (k, D))
    # weights [F,1,k,D] are stored pre-transposed as (k, D, F).
    params = {
        "emb": emb,
        "wq": init(ks[1], (D_MODEL, D_MODEL)), "bq": init(ks[2], (1, D_MODEL)),
        "wk": init(ks[3], (D_MODEL, D_MODEL)), "bk": init(ks[4], (1, D_MODEL)),
        "wv": init(ks[5], (D_MODEL, D_MODEL)), "bv": init(ks[6], (1, D_MODEL)),
        "wo": init(ks[7], (D_MODEL, D_MODEL)), "bo": init(ks[8], (1, D_MODEL)),
        "wc2": init(ks[9], (2, D_MODEL, NUM_FILTERS)), "bc2": init(ks[10], (1, NUM_FILTERS)),
        "wc3": init(ks[11], (3, D_MODEL, NUM_FILTERS)), "bc3": init(ks[12], (1, NUM_FILTERS)),
        "wc4": init(ks[13], (4, D_MODEL, NUM_FILTERS)), "bc4": init(ks[14], (1, NUM_FILTERS)),
        "wfc": init(ks[15], (TOT_F, NUM_CLASSES)),
        "bfc": jnp.zeros((1, NUM_CLASSES), jnp.float32),
    }

    slab = pack_params(params)   # one-time packing (hoisted out of the jitted forward)
    tokens = jax.random.randint(jax.random.PRNGKey(123), (B, S), 0, VOCAB, dtype=jnp.int32)

    out = jax.block_until_ready(model_forward(tokens, slab))
    ref = jax.block_until_ready(reference_forward(tokens, params))
    assert out.shape == (B, NUM_CLASSES)
    # tolerance absorbs default-precision (bf16-pass) MXU matmuls on both sides
    assert jnp.allclose(out, ref, atol=2e-3, rtol=2e-3), (out, ref)
    print("KERNEL_OK")
</pallas_src>

<mosaic_0001>
module attributes {stable_mosaic.version = 11 : i64} {
  func.func @fused_kernel(%arg0: i32, %arg1: memref<16x1xi32, #tpu.memory_space<vmem>>, %arg2: memref<480x128xf32, #tpu.memory_space<vmem>>, %arg3: memref<2x128xf32, #tpu.memory_space<vmem>>) attributes {dimension_semantics = [#tpu.dimension_semantics<arbitrary>], iteration_bounds = array<i64: 1>, scalar_prefetch = 0 : i64, scratch_operands = 0 : i64, tpu.core_type = #tpu.core_type<tc>, window_params = [{pipeline_mode = #tpu.pipeline_mode<synchronous>, transform_indices = @transform_0, window_bounds = array<i64: 16, 1>}, {pipeline_mode = #tpu.pipeline_mode<synchronous>, transform_indices = @transform_1, window_bounds = array<i64: 480, 128>}, {pipeline_mode = #tpu.pipeline_mode<synchronous>, transform_indices = @transform_2, window_bounds = array<i64: 2, 128>}]} {
    %c0 = arith.constant 0 : index
    %c0_0 = arith.constant 0 : index
    %0 = vector.load %arg1[%c0, %c0_0] : memref<16x1xi32, #tpu.memory_space<vmem>>, vector<16x1xi32>
    %1 = tpu.iota {dimensions = array<i32: 1>} : vector<16x56xi32>
    %2 = vector.broadcast %0 : vector<16x1xi32> to vector<16x56xi32>
    %3 = arith.cmpi eq, %1, %2 : vector<16x56xi32>
    %4 = arith.extui %3 : vector<16x56xi1> to vector<16x56xi32>
    %5 = arith.sitofp %4 : vector<16x56xi32> to vector<16x56xf32>
    %c0_1 = arith.constant 0 : index
    %c0_2 = arith.constant 0 : index
    %6 = vector.load %arg2[%c0_1, %c0_2] : memref<480x128xf32, #tpu.memory_space<vmem>>, vector<56x32xf32>
    %cst = arith.constant dense<0.000000e+00> : vector<16x32xf32>
    %7 = tpu.matmul %5, %6, %cst {dimension_numbers = #tpu.dot_dimension_numbers<[1], [0], [0], [1], [0, 0, 1, 1], [], []>} : vector<16x56xf32>, vector<56x32xf32>, vector<16x32xf32> -> vector<16x32xf32>
    %cst_3 = arith.constant 5.65685415 : f32
    %8 = vector.broadcast %cst_3 : f32 to vector<16x32xf32>
    %9 = arith.mulf %7, %8 : vector<16x32xf32>
    %c56 = arith.constant 56 : index
    %c0_4 = arith.constant 0 : index
    %10 = vector.load %arg2[%c56, %c0_4] : memref<480x128xf32, #tpu.memory_space<vmem>>, vector<32x96xf32>
    %cst_5 = arith.constant dense<0.000000e+00> : vector<16x96xf32>
    %11 = tpu.matmul %9, %10, %cst_5 {dimension_numbers = #tpu.dot_dimension_numbers<[1], [0], [0], [1], [0, 0, 1, 1], [], []>} : vector<16x32xf32>, vector<32x96xf32>, vector<16x96xf32> -> vector<16x96xf32>
    %c88 = arith.constant 88 : index
    %c0_6 = arith.constant 0 : index
    %12 = vector.load %arg2[%c88, %c0_6] : memref<480x128xf32, #tpu.memory_space<vmem>>, vector<1x96xf32>
    %13 = vector.broadcast %12 : vector<1x96xf32> to vector<16x96xf32>
    %14 = arith.addf %11, %13 : vector<16x96xf32>
    %15 = vector.extract_strided_slice %14 {offsets = [0, 0], sizes = [16, 32], strides = [1, 1]} : vector<16x96xf32> to vector<16x32xf32>
    %16 = vector.extract_strided_slice %14 {offsets = [0, 32], sizes = [16, 32], strides = [1, 1]} : vector<16x96xf32> to vector<16x32xf32>
    %17 = vector.extract_strided_slice %14 {offsets = [0, 64], sizes = [16, 32], strides = [1, 1]} : vector<16x96xf32> to vector<16x32xf32>
    %c304 = arith.constant 304 : index
    %c0_7 = arith.constant 0 : index
    %18 = vector.load %arg2[%c304, %c0_7] : memref<480x128xf32, #tpu.memory_space<vmem>>, vector<64x32xf32>
    %19 = tpu.concatenate %16, %16, %16, %16 in 0 : vector<16x32xf32>, vector<16x32xf32>, vector<16x32xf32>, vector<16x32xf32> -> vector<64x32xf32>
    %20 = arith.mulf %19, %18 : vector<64x32xf32>
    %21 = tpu.concatenate %17, %17, %17, %17 in 0 : vector<16x32xf32>, vector<16x32xf32>, vector<16x32xf32>, vector<16x32xf32> -> vector<64x32xf32>
    %22 = arith.mulf %21, %18 : vector<64x32xf32>
    %cst_8 = arith.constant dense<0.000000e+00> : vector<16x64xf32>
    %23 = tpu.matmul %15, %20, %cst_8 {dimension_numbers = #tpu.dot_dimension_numbers<[1], [1], [0], [0], [0, 0, 1, 0], [], []>} : vector<16x32xf32>, vector<64x32xf32>, vector<16x64xf32> -> vector<16x64xf32>
    %cst_9 = arith.constant 0.353553385 : f32
    %24 = vector.broadcast %cst_9 : f32 to vector<16x64xf32>
    %25 = arith.mulf %23, %24 : vector<16x64xf32>
    %c432 = arith.constant 432 : index
    %c0_10 = arith.constant 0 : index
    %26 = vector.load %arg2[%c432, %c0_10] : memref<480x128xf32, #tpu.memory_space<vmem>>, vector<16x64xf32>
    %27 = arith.addf %25, %26 : vector<16x64xf32>
    %cst_11 = arith.constant dense<0xFF800000> : vector<16xf32>
    %28 = vector.multi_reduction <maximumf>, %27, %cst_11 [1] : vector<16x64xf32> to vector<16xf32>
    %29 = vector.shape_cast %28 : vector<16xf32> to vector<16x1xf32>
    %30 = vector.broadcast %29 : vector<16x1xf32> to vector<16x64xf32>
    %31 = arith.subf %27, %30 : vector<16x64xf32>
    %32 = math.exp %31 : vector<16x64xf32>
    %c368 = arith.constant 368 : index
    %c0_12 = arith.constant 0 : index
    %33 = vector.load %arg2[%c368, %c0_12] : memref<480x128xf32, #tpu.memory_space<vmem>>, vector<64x64xf32>
    %cst_13 = arith.constant dense<0.000000e+00> : vector<16x64xf32>
    %34 = tpu.matmul %32, %33, %cst_13 {dimension_numbers = #tpu.dot_dimension_numbers<[1], [0], [0], [1], [0, 0, 1, 1], [], []>} : vector<16x64xf32>, vector<64x64xf32>, vector<16x64xf32> -> vector<16x64xf32>
    %c448 = arith.constant 448 : index
    %c0_14 = arith.constant 0 : index
    %35 = vector.load %arg2[%c448, %c0_14] : memref<480x128xf32, #tpu.memory_space<vmem>>, vector<16x64xf32>
    %36 = arith.addf %34, %35 : vector<16x64xf32>
    %37 = arith.divf %32, %36 : vector<16x64xf32>
    %cst_15 = arith.constant dense<0.000000e+00> : vector<16x32xf32>
    %38 = tpu.matmul %37, %22, %cst_15 {dimension_numbers = #tpu.dot_dimension_numbers<[1], [0], [0], [1], [0, 0, 1, 1], [], []>} : vector<16x64xf32>, vector<64x32xf32>, vector<16x32xf32> -> vector<16x32xf32>
    %c96 = arith.constant 96 : index
    %c0_16 = arith.constant 0 : index
    %39 = vector.load %arg2[%c96, %c0_16] : memref<480x128xf32, #tpu.memory_space<vmem>>, vector<32x32xf32>
    %cst_17 = arith.constant dense<0.000000e+00> : vector<16x32xf32>
    %40 = tpu.matmul %38, %39, %cst_17 {dimension_numbers = #tpu.dot_dimension_numbers<[1], [0], [0], [1], [0, 0, 1, 1], [], []>} : vector<16x32xf32>, vector<32x32xf32>, vector<16x32xf32> -> vector<16x32xf32>
    %c128 = arith.constant 128 : index
    %c0_18 = arith.constant 0 : index
    %41 = vector.load %arg2[%c128, %c0_18] : memref<480x128xf32, #tpu.memory_space<vmem>>, vector<1x32xf32>
    %42 = vector.broadcast %41 : vector<1x32xf32> to vector<16x32xf32>
    %43 = arith.addf %40, %42 : vector<16x32xf32>
    %c136 = arith.constant 136 : index
    %c0_19 = arith.constant 0 : index
    %44 = vector.load %arg2[%c136, %c0_19] : memref<480x128xf32, #tpu.memory_space<vmem>>, vector<32x24xf32>
    %cst_20 = arith.constant dense<0.000000e+00> : vector<16x24xf32>
    %45 = tpu.matmul %43, %44, %cst_20 {dimension_numbers = #tpu.dot_dimension_numbers<[1], [0], [0], [1], [0, 0, 1, 1], [], []>} : vector<16x32xf32>, vector<32x24xf32>, vector<16x24xf32> -> vector<16x24xf32>
    %c15_i32 = arith.constant 15 : i32
    %46 = tpu.dynamic_rotate %43 by %c15_i32 dim 0 : vector<16x32xf32>, i32 -> vector<16x32xf32>
    %c168 = arith.constant 168 : index
    %c0_21 = arith.constant 0 : index
    %47 = vector.load %arg2[%c168, %c0_21] : memref<480x128xf32, #tpu.memory_space<vmem>>, vector<32x24xf32>
    %cst_22 = arith.constant dense<0.000000e+00> : vector<16x24xf32>
    %48 = tpu.matmul %46, %47, %cst_22 {dimension_numbers = #tpu.dot_dimension_numbers<[1], [0], [0], [1], [0, 0, 1, 1], [], []>} : vector<16x32xf32>, vector<32x24xf32>, vector<16x24xf32> -> vector<16x24xf32>
    %49 = arith.addf %45, %48 : vector<16x24xf32>
    %c14_i32 = arith.constant 14 : i32
    %50 = tpu.dynamic_rotate %43 by %c14_i32 dim 0 : vector<16x32xf32>, i32 -> vector<16x32xf32>
    %c200 = arith.constant 200 : index
    %c0_23 = arith.constant 0 : index
    %51 = vector.load %arg2[%c200, %c0_23] : memref<480x128xf32, #tpu.memory_space<vmem>>, vector<32x24xf32>
    %cst_24 = arith.constant dense<0.000000e+00> : vector<16x24xf32>
    %52 = tpu.matmul %50, %51, %cst_24 {dimension_numbers = #tpu.dot_dimension_numbers<[1], [0], [0], [1], [0, 0, 1, 1], [], []>} : vector<16x32xf32>, vector<32x24xf32>, vector<16x24xf32> -> vector<16x24xf32>
    %53 = arith.addf %49, %52 : vector<16x24xf32>
    %c13_i32 = arith.constant 13 : i32
    %54 = tpu.dynamic_rotate %43 by %c13_i32 dim 0 : vector<16x32xf32>, i32 -> vector<16x32xf32>
    %c232 = arith.constant 232 : index
    %c0_25 = arith.constant 0 : index
    %55 = vector.load %arg2[%c232, %c0_25] : memref<480x128xf32, #tpu.memory_space<vmem>>, vector<32x24xf32>
    %cst_26 = arith.constant dense<0.000000e+00> : vector<16x24xf32>
    %56 = tpu.matmul %54, %55, %cst_26 {dimension_numbers = #tpu.dot_dimension_numbers<[1], [0], [0], [1], [0, 0, 1, 1], [], []>} : vector<16x32xf32>, vector<32x24xf32>, vector<16x24xf32> -> vector<16x24xf32>
    %57 = arith.addf %53, %56 : vector<16x24xf32>
    %c264 = arith.constant 264 : index
    %c0_27 = arith.constant 0 : index
    %58 = vector.load %arg2[%c264, %c0_27] : memref<480x128xf32, #tpu.memory_space<vmem>>, vector<1x24xf32>
    %59 = vector.broadcast %58 : vector<1x24xf32> to vector<16x24xf32>
    %60 = arith.addf %57, %59 : vector<16x24xf32>
    %cst_28 = arith.constant 0.000000e+00 : f32
    %61 = vector.broadcast %cst_28 : f32 to vector<16x24xf32>
    %62 = arith.maximumf %60, %61 : vector<16x24xf32>
    %c464 = arith.constant 464 : index
    %c0_29 = arith.constant 0 : index
    %63 = vector.load %arg2[%c464, %c0_29] : memref<480x128xf32, #tpu.memory_space<vmem>>, vector<16x24xf32>
    %64 = arith.mulf %62, %63 : vector<16x24xf32>
    %65 = vector.extract_strided_slice %64 {offsets = [0, 0], sizes = [8, 24], strides = [1, 1]} : vector<16x24xf32> to vector<8x24xf32>
    %cst_30 = arith.constant dense<0xFF800000> : vector<24xf32>
    %66 = vector.multi_reduction <maximumf>, %65, %cst_30 [0] : vector<8x24xf32> to vector<24xf32>
    %67 = vector.shape_cast %66 : vector<24xf32> to vector<1x24xf32>
    %68 = vector.extract_strided_slice %64 {offsets = [8, 0], sizes = [8, 24], strides = [1, 1]} : vector<16x24xf32> to vector<8x24xf32>
    %cst_31 = arith.constant dense<0xFF800000> : vector<24xf32>
    %69 = vector.multi_reduction <maximumf>, %68, %cst_31 [0] : vector<8x24xf32> to vector<24xf32>
    %70 = vector.shape_cast %69 : vector<24xf32> to vector<1x24xf32>
    %71 = tpu.concatenate %67, %70 in 0 : vector<1x24xf32>, vector<1x24xf32> -> vector<2x24xf32>
    %c272 = arith.constant 272 : index
    %c0_32 = arith.constant 0 : index
    %72 = vector.load %arg2[%c272, %c0_32] : memref<480x128xf32, #tpu.memory_space<vmem>>, vector<24x128xf32>
    %cst_33 = arith.constant dense<0.000000e+00> : vector<2x128xf32>
    %73 = tpu.matmul %71, %72, %cst_33 {dimension_numbers = #tpu.dot_dimension_numbers<[1], [0], [0], [1], [0, 0, 1, 1], [], []>} : vector<2x24xf32>, vector<24x128xf32>, vector<2x128xf32> -> vector<2x128xf32>
    %c296 = arith.constant 296 : index
    %c0_34 = arith.constant 0 : index
    %74 = vector.load %arg2[%c296, %c0_34] : memref<480x128xf32, #tpu.memory_space<vmem>>, vector<1x128xf32>
    %75 = vector.broadcast %74 : vector<1x128xf32> to vector<2x128xf32>
    %76 = arith.addf %73, %75 : vector<2x128xf32>
    %c0_35 = arith.constant 0 : index
    %c0_36 = arith.constant 0 : index
    %77 = vector.load %arg3[%c0_35, %c0_36] : memref<2x128xf32, #tpu.memory_space<vmem>>, vector<2x128xf32>
    tpu.vector_store %arg3[%c0_35, %c0_36], %76 {strides = array<i32>} : memref<2x128xf32, #tpu.memory_space<vmem>>, vector<2x128xf32>,
    return
  }
  func.func @transform_0(%arg0: i32) -> (i32, i32) {
    %c0_i32 = arith.constant 0 : i32
    %c0_i32_0 = arith.constant 0 : i32
    %c0_i32_1 = arith.constant 0 : i32
    return %c0_i32, %c0_i32_0 : i32, i32
  }
  func.func @transform_1(%arg0: i32) -> (i32, i32) {
    %c0_i32 = arith.constant 0 : i32
    %c0_i32_0 = arith.constant 0 : i32
    %c0_i32_1 = arith.constant 0 : i32
    return %c0_i32, %c0_i32_0 : i32, i32
  }
  func.func @transform_2(%arg0: i32) -> (i32, i32) {
    %c0_i32 = arith.constant 0 : i32
    %c0_i32_0 = arith.constant 0 : i32
    %c0_i32_1 = arith.constant 0 : i32
    return %c0_i32, %c0_i32_0 : i32, i32
  }
}

</mosaic_0001>

<bundles_post_ra>
// kernel: model_forward.1
= control target key start
LH: loop header
LB: loop body
LE: loop exit
PB: predicated region body
PF: predicated region fallthrough
CT: control target
= control target key end

     0   :  { %7 = vsyncpa [#allocation3], 0  ;;  %s1899_s0 = inlined_call_operand.vmem [shape: s32[16,1], index: 0, kind: input, shape index: {}]   ;;  %s1900_s1 = inlined_call_operand.hbm [shape: f32[480,128], index: 1, kind: input, shape index: {}]   ;;  %s1901_s2 = inlined_call_operand.hbm [shape: f32[2,128], index: 2, kind: output, shape index: {}]  }
   0x1   :  { %8 = vsyncpa [#allocation4], 0  ;;  %s1726_s9 = smov [#allocation2]   ;;  %s1678_s13 = scalar_lea.hbm %s1900_s1, 7680 }
   0x2   :  { %s16_s10 = sshll.u32 %s1726_s9, 4  ;;  %p1679_p0 = scmp.ne.s32.totalorder %s1900_s1, %s1678_s13  ;;  %s17_s10 = int_to_ptr.vmem [resolvable:$true] %s16_s10 }
   0x3   :  { %p1682_p1 = scmp.lt.u32.totalorder %s1678_s13, %s1900_s1 }
   0x5   :  { %p1684_p2 = pnand %p1682_p1, %p1679_p0 }
   0x7   :  { %1687 = shalt.err (!%p1684_p2)
}
   0x8   :  { %s1688_s18 = scalar_lea.vmem %s17_s10, 7680  ;;  %p1693_p4 = scmp.lt.s32.totalorder %s17_s10, %s17_s10 }
   0x9   :  { %p1689_p3 = scmp.ne.s32.totalorder %s17_s10, %s1688_s18  ;;  %p1694_p5 = scmp.lt.s32.totalorder %s1688_s18, %s1688_s18 }
   0xb   :  { %p1695_p6 = por %p1694_p5, %p1693_p4 }
   0xd   :  { %p1696_p7 = pnand %p1695_p6, %p1689_p3 }
   0xf   :  { %1699 = shalt.err (!%p1696_p7)
}
  0x10   :  { %s1727_s19 = smov 128   ;;  %s1728_s20 = smov 8  }
  0x11   :  { %22 = dma.hbm_to_vmem [thread:$0]  %s1900_s1, 7680, %s17_s10, [#allocation3], %s1727_s19, %s1727_s19, %s1728_s20  }
  0x12   :  { %1722 = dma.done.wait [#allocation3], 7680  }
  0x13   :  { %1723 = vsyncadd [#allocation3], 4294959616  ;;  %v1729_v0 = vmov 0   ;;  %v26_v1 = vld [vmem:[%s1899_s0] sm:$0xff]  ;;  %v43_v3 = vld [vmem:[#allocation2 + $0x8] sm:$0xff]  ;;  %v28_v16 = vlaneseq  ;;  %vm49_vm0 = vcmask 457728  }
  0x14   :  { %1629 = vset.pattern.permute.xlu0 %v1729_v0  ;;  %v42_v2 = vld [vmem:[#allocation2] sm:$0xff]  ;;  %v44_v4 = vld [vmem:[#allocation2 + $0x10] sm:$0xff]  ;;  %v45_v5 = vld [vmem:[#allocation2 + $0x18] sm:$0xff]  ;;  %v1730_v19 = vmov 0.0   ;;  %vm142_vm3 = vcmask 261120   ;;  %s1732_s1 = smov 96  }
  0x15   :  { %31 = vperm.xlu0 %1629, %v26_v1   ;;  %v27_v6 = vld [vmem:[%s1899_s0 + $0x8] sm:$0xff]  ;;  %v1493_v7 = vpack.c.bf16 %v43_v3, %v42_v2  ;;  %v1497_v8 = vpack.c.bf16 %v45_v5, %v44_v4  ;;  %v46_v9 = vld [vmem:[#allocation2 + $0x20] sm:$0xff]  ;;  %v48_v12 = vld [vmem:[#allocation2 + $0x30] sm:$0xff]  ;;  %v29_v17 = vand.u32 127, %v28_v16  ;;  %s1731_s0 = smov 32   ;;  %vm431_vm5 = vcmask 523264  }
  0x16   :  { %v47_v10 = vld [vmem:[#allocation2 + $0x28] sm:$0xff]  ;;  %v133_v13 = vld [vmem:[#allocation2 + $0x38] sm:$0xff]  ;;  %v134_v14 = vld [vmem:[#allocation2 + $0x40] sm:$0xff]  ;;  %s1733_s27 = smov 64   ;;  %vm1735_vm9 = vmmov 0   ;;  %vm1116_vm10 = vcmask 195584  }
  0x17   :  { %1494 = vmatprep.subr.bf16.mxu1 %v1493_v7  ;;  %v1501_v11 = vpack.c.bf16 %v47_v10, %v46_v9  ;;  %v1505_v15 = vpack.c.bf16 %v134_v14, %v133_v13  ;;  %v135_v23 = vld [vmem:[#allocation2 + $0x48] sm:$0xff]  ;;  %v136_v24 = vld [vmem:[#allocation2 + $0x50] sm:$0xff]  ;;  %v1776_v27 = vld [vmem:[#allocation2 + $0x140] sm:$0xff]  ;;  %vm1131_vm11 = vcmask 1040384   ;;  %s1736_s28 = smov [#allocation5]  }
  0x18   :  { %1496 = vmatpush3.bf16.msra.mxu1 %v1493_v7  ;;  %v1509_v25 = vpack.c.bf16 %v136_v24, %v135_v23  ;;  %v1773_v26 = vld [vmem:[#allocation2 + $0x130] sm:$0xff]  ;;  %v1778_v28 = vld [vmem:[#allocation2 + $0x138] sm:$0xff]  ;;  %v1784_v30 = vld [vmem:[#allocation2 + $0x148] sm:$0xff]  ;;  %s1221_s29 = sshll.u32 %s1736_s28, 4  ;;  %s1222_s29 = int_to_ptr.vmem [resolvable:$true] %s1221_s29 }
  0x19   :  { %34 = vperm.xlu0 %1629, %v27_v6   ;;  %1498 = vmatprep.subr.bf16.mxu1 %v1497_v8  ;;  %v1781_v29 = vld [vmem:[#allocation2 + $0x150] sm:$0xff]  ;;  %v1787_v31 = vld [vmem:[#allocation2 + $0x160] sm:$0xff]  ;;  %v1790_v32 = vld [vmem:[#allocation2 + $0x158] sm:$0xff]  ;;  %s1700_s30 = scalar_lea.vmem %s1222_s29, 32  ;;  %p1705_p9 = scmp.lt.s32.totalorder %s1222_s29, %s1222_s29 }
  0x1a   :  { %240 = vrot.lane.b32.xlu1 %v1773_v26, %s1731_s0  ;;  %v1794_v33 = vld [vmem:[#allocation2 + $0x168] sm:$0xff]  ;;  %v1234_v44 = vld [vmem:[#allocation2 + $0x58] ss:$0 sm:$0xff]  ;;  %vm1815_vm4 = vmpackc.low %vm142_vm3, %vm142_vm3  ;;  %p1701_p8 = scmp.ne.s32.totalorder %s1222_s29, %s1700_s30  ;;  %p1706_p10 = scmp.lt.s32.totalorder %s1700_s30, %s1700_s30 }
  0x1c   :  { %1500 = vmatpush3.bf16.msra.mxu1 %v1497_v8  ;;  %p1707_p11 = por %p1706_p10, %p1705_p9 }
  0x1d   :  { %1502 = vmatprep.subr.bf16.mxu1 %v1501_v11  ;;  %244 = vrot.lane.b32.xlu0 %v1776_v27, %s1731_s0 }
  0x1e   :  { %242 = vrot.lane.b32.xlu1 %v1778_v28, %s1731_s0  ;;  %p1708_p12 = pnand %p1707_p11, %p1701_p8 }
  0x20   :  { %1504 = vmatpush3.bf16.msra.mxu1 %v1501_v11 }
  0x21   :  { %1356 = vmatprep.subr.mxu1 %v48_v12  ;;  %248 = vrot.lane.b32.xlu0 %v1781_v29, %s1731_s0 }
  0x22   :  { %246 = vrot.lane.b32.xlu1 %v1784_v30, %s1731_s0 }
  0x24   :  { %1357 = vmatpush3.msra.mxu1 %v48_v12 }
  0x25   :  { %1506 = vmatprep.subr.bf16.mxu1 %v1505_v15  ;;  %252 = vrot.lane.b32.xlu0 %v1787_v31, %s1731_s0 }
  0x26   :  { %250 = vrot.lane.b32.xlu1 %v1790_v32, %s1731_s0 }
  0x2a   :  { %254 = vrot.lane.b32.xlu1 %v1794_v33, %s1731_s0 }
  0x8c   :  { %v241_v38 = vpop.permute.xlu1 %240 }
  0x90   :  { %v243_v39 = vpop.permute.xlu1 %242 }
  0x94   :  { %v32_v18 = vpop.permute.xlu0 %31  ;;  %v247_v40 = vpop.permute.xlu1 %246 }
  0x95   :  { %vm36_vm1 = vcmp.eq.s32.totalorder %v29_v17, %v32_v18  ;;  %v428_v18 = vld [vmem:[#allocation2 + $0x1b8] sm:$0xff] }
  0x96   :  { %v1230_v20 = vsel %vm36_vm1, 1.0, %v1730_v19 }
  0x97   :  { %1358 = vmatprep.mubr.msk.f32.mxu1 %vm49_vm0, %v1230_v20 }
  0x98   :  { %v35_v21 = vpop.permute.xlu0 %34  ;;  %v251_v42 = vpop.permute.xlu1 %250 }
  0x99   :  { %vm37_vm2 = vcmp.eq.s32.totalorder %v29_v17, %v35_v21 }
  0x9a   :  { %v1231_v22 = vsel %vm37_vm2, 1.0, %v1730_v19 }
  0x9b   :  { %1359 = vmatmul.mubr.msk.f32.vlgmr.msra.gmra.mrb[0].mxu1 %vm49_vm0, %v1231_v22  ;;  %v427_v22 = vld [vmem:[#allocation2 + $0x1b0] sm:$0xff] }
  0x9c   :  { %1508 = vmatpush3.bf16.msra.mxu1 %v1505_v15  ;;  %v245_v41 = vpop.permute.xlu0 %244  ;;  %v255_v49 = vpop.permute.xlu1 %254 }
  0x9d   :  { %1510 = vmatprep.subr.bf16.mxu1 %v1509_v25 }
  0xa0   :  { %1512 = vmatpush3.bf16.msra.mxu1 %v1509_v25  ;;  %v249_v43 = vpop.permute.xlu0 %248 }
  0xa4   :  { %v253_v50 = vpop.permute.xlu0 %252 }
 0x16e   :  { %v1360_v34 = vpop.f32.mrb[0].mxu1 }
 0x16f   :  { %v122_v35 = vpop.f32.mrb[1].mxu1  ;;  %v132_v37 = vmul.f32 5.656854, %v1360_v34 }
 0x170   :  { %v131_v36 = vmul.f32 5.656854, %v122_v35 }
 0x172   :  { %1369 = vmatprep.mubr.msk.f32.mxu1 %vm142_vm3, %v131_v36  ;;  %v444_v36 = vld [vmem:[#allocation2 + $0x170] sm:$0xff] }
 0x173   :  { %1370 = vmatmul.mubr.msk.f32.vlgmr.msra.gmra.mrb[2].mxu1 %vm142_vm3, %v132_v37  ;;  %v445_v37 = vld [vmem:[#allocation2 + $0x178] sm:$0xff] }
 0x246   :  { %v1371_v45 = vpop.f32.mrb[2].mxu1 }
 0x247   :  { %v1799_v46 = vadd.f32 %v1371_v45, %v1234_v44  ;;  %v215_v47 = vpop.f32.mrb[3].mxu1  ;;  %v450_v45 = vld [vmem:[#allocation2 + $0x1a0] sm:$0xff] }
 0x248   :  { %v1801_v48 = vadd.f32 %v1234_v44, %v215_v47  ;;  %v451_v47 = vld [vmem:[#allocation2 + $0x1a8] sm:$0xff] }
 0x249   :  { %v265_v51 = vmul.f32 %v243_v39, %v1799_v46  ;;  %v267_v52 = vmul.f32 %v247_v40, %v1799_v46  ;;  %v271_v55 = vmul.f32 %v255_v49, %v1799_v46  ;;  %v269_v56 = vmul.f32 %v251_v42, %v1799_v46  ;;  %v446_v39 = vld [vmem:[#allocation2 + $0x180] sm:$0xff]  ;;  %v447_v40 = vld [vmem:[#allocation2 + $0x188] sm:$0xff]  ;;  %v448_v42 = vld [vmem:[#allocation2 + $0x190] sm:$0xff] }
 0x24a   :  { %1388 = vmatprep.mubr.msk.f32.mxu1 %vm142_vm3, %v1801_v48  ;;  %v264_v53 = vmul.f32 %v241_v38, %v1801_v48  ;;  %v266_v54 = vmul.f32 %v245_v41, %v1801_v48  ;;  %v270_v57 = vmul.f32 %v253_v50, %v1801_v48  ;;  %v268_v60 = vmul.f32 %v249_v43, %v1801_v48  ;;  %v449_v43 = vld [vmem:[#allocation2 + $0x198] sm:$0xff] }
 0x24b   :  { %v1537_v38 = vpack.c.bf16 %v445_v37, %v444_v36  ;;  %v1541_v41 = vpack.c.bf16 %v447_v40, %v446_v39  ;;  %v1545_v44 = vpack.c.bf16 %v449_v43, %v448_v42  ;;  %v453_v36 = vld [vmem:[#allocation2 + $0x1c8] sm:$0xff]  ;;  %v452_v37 = vld [vmem:[#allocation2 + $0x1c0] sm:$0xff] }
 0x24c   :  { %v1630_v58 = vpack.i.bf16 %v265_v51, %v264_v53  ;;  %v1635_v59 = vpack.i.bf16 %v267_v52, %v266_v54  ;;  %v1645_v61 = vpack.i.bf16 %v271_v55, %v270_v57  ;;  %v1640_v62 = vpack.i.bf16 %v269_v56, %v268_v60 }
 0x24d   :  { %1538 = vmatprep.subr.bf16.mxu0 %v1537_v38 }
 0x24e   :  { %1631 = vrot.lane.b32.xlu0 %v1630_v58, %s1732_s1  ;;  %1636 = vrot.lane.b32.xlu1 %v1635_v59, %s1732_s1 }
 0x24f   :  { %1540 = vmatpush3.bf16.msra.mxu0 %v1537_v38 }
 0x250   :  { %1542 = vmatprep.subr.bf16.mxu0 %v1541_v41 }
 0x252   :  { %1641 = vrot.lane.b32.xlu0 %v1640_v62, %s1732_s1  ;;  %1646 = vrot.lane.b32.xlu1 %v1645_v61, %s1732_s1 }
 0x253   :  { %1544 = vmatpush3.bf16.msra.mxu0 %v1541_v41 }
 0x254   :  { %1546 = vmatprep.subr.bf16.mxu0 %v1545_v44 }
 0x257   :  { %1548 = vmatpush3.bf16.msra.mxu0 %v1545_v44 }
 0x2c0   :  { %v1637_v63 = vpop.permute.xlu1 %1636  ;;  %v1632_v0 = vpop.permute.xlu0 %1631 }
 0x2c1   :  { %v1639_v1 = vunpack.i.h.bf16 %v1637_v63  ;;  %v1638_v2 = vunpack.i.l.bf16 %v1637_v63  ;;  %v1634_v3 = vunpack.i.h.bf16 %v1632_v0  ;;  %v1633_v4 = vunpack.i.l.bf16 %v1632_v0 }
 0x2c3   :  { %v1513_v6 = vpack.c.bf16 %v1634_v3, %v1633_v4  ;;  %v1519_v7 = vpack.c.bf16 %v1639_v1, %v1638_v2 }
 0x2c4   :  { %v1642_v8 = vpop.permute.xlu0 %1641  ;;  %v1647_v12 = vpop.permute.xlu1 %1646 }
 0x2c5   :  { %1515 = vmatprep.subr.msk.bf16.mxu1 %vm1815_vm4, %v1513_v6  ;;  %v1644_v9 = vunpack.i.h.bf16 %v1642_v8  ;;  %v1643_v10 = vunpack.i.l.bf16 %v1642_v8  ;;  %v1649_v13 = vunpack.i.h.bf16 %v1647_v12  ;;  %v1648_v14 = vunpack.i.l.bf16 %v1647_v12  ;;  %v654_v8 = vld [vmem:[#allocation2 + $0x70] sm:$0xff] }
 0x2c6   :  { %1518 = vmatpush3.bf16.xpose.msk.msra.mxu1 %vm1815_vm4, %v1513_v6  ;;  %v652_v6 = vld [vmem:[#allocation2 + $0x60] sm:$0xff] }
 0x2c7   :  { %1521 = vmatprep.subr.msk.bf16.mxu1 %vm1815_vm4, %v1519_v7  ;;  %v1525_v11 = vpack.c.bf16 %v1644_v9, %v1643_v10  ;;  %v1531_v15 = vpack.c.bf16 %v1649_v13, %v1648_v14  ;;  %v655_v10 = vld [vmem:[#allocation2 + $0x78] sm:$0xff] }
 0x2ce   :  { %1524 = vmatpush3.bf16.xpose.msk.msra.mxu1 %vm1815_vm4, %v1519_v7  ;;  %v653_v7 = vld [vmem:[#allocation2 + $0x68] sm:$0xff] }
 0x2cf   :  { %1527 = vmatprep.subr.msk.bf16.mxu1 %vm1815_vm4, %v1525_v11  ;;  %v1569_v9 = vpack.c.bf16 %v653_v7, %v652_v6  ;;  %v925_v6 = vld [vmem:[#allocation2 + $0xd0] sm:$0xff] }
 0x2d6   :  { %1530 = vmatpush3.bf16.xpose.msk.msra.mxu1 %vm1815_vm4, %v1525_v11  ;;  %v1573_v11 = vpack.c.bf16 %v655_v10, %v654_v8  ;;  %v926_v10 = vld [vmem:[#allocation2 + $0xd8] sm:$0xff] }
 0x2d7   :  { %1533 = vmatprep.subr.msk.bf16.mxu1 %vm1815_vm4, %v1531_v15 }
 0x2de   :  { %1536 = vmatpush3.bf16.xpose.msk.msra.mxu1 %vm1815_vm4, %v1531_v15 }
 0x2df   :  { %1570 = vmatprep.subr.bf16.mxu1 %v1569_v9 }
 0x2e5   :  { %1389 = vmatmul.mubr.msk.f32.vlgmr.msra.gmra.mrb[4].mxu1 %vm142_vm3, %v1799_v46 }
 0x2e6   :  { %1572 = vmatpush3.bf16.msra.mxu1 %v1569_v9 }
 0x2e7   :  { %1574 = vmatprep.subr.bf16.mxu1 %v1573_v11 }
 0x2ea   :  { %1576 = vmatpush3.bf16.msra.mxu1 %v1573_v11  ;;  %v927_v11 = vld [vmem:[#allocation2 + $0xe0] sm:$0xff] }
 0x3b8   :  { %v1390_v17 = vpop.f32.mrb[4].mxu1 }
 0x3b9   :  { %v426_v20 = vmul.f32 0.35355338, %v1390_v17  ;;  %v416_v21 = vpop.f32.mrb[5].mxu1 }
 0x3ba   :  { %v425_v23 = vmul.f32 0.35355338, %v416_v21 }
 0x3bb   :  { %v430_v24 = vadd.f32 %v428_v18, %v426_v20 }
 0x3bc   :  { %v429_v25 = vadd.f32 %v427_v22, %v425_v23 }
 0x3bd   :  { %v435_v34 = vsel %vm431_vm5, %v430_v24, -inf }
 0x3be   :  { %436 = vmax.xlane.f32.xlu1 %v435_v34  ;;  %v432_v35 = vsel %vm431_vm5, %v429_v25, -inf }
 0x3bf   :  { %433 = vmax.xlane.f32.xlu0 %v432_v35 }
 0x3cf   :  { %274 = vrot.lane.b32.xlu1 %v1778_v28, %s1733_s27  ;;  %v1549_v28 = vpack.c.bf16 %v451_v47, %v450_v45  ;;  %v753_v47 = vld [vmem:[#allocation2 + $0xa8] sm:$0xff] }
 0x3d1   :  { %1550 = vmatprep.subr.bf16.mxu0 %v1549_v28 }
 0x3d2   :  { %1552 = vmatpush3.bf16.msra.mxu0 %v1549_v28  ;;  %v754_v28 = vld [vmem:[#allocation2 + $0xb0] sm:$0xff] }
 0x3d3   :  { %278 = vrot.lane.b32.xlu1 %v1784_v30, %s1733_s27 }
 0x3d5   :  { %272 = vrot.lane.b32.xlu0 %v1773_v26, %s1733_s27 }
 0x3d7   :  { %282 = vrot.lane.b32.xlu1 %v1790_v32, %s1733_s27 }
 0x3d9   :  { %276 = vrot.lane.b32.xlu0 %v1776_v27, %s1733_s27 }
 0x3db   :  { %286 = vrot.lane.b32.xlu1 %v1794_v33, %s1733_s27 }
 0x3dd   :  { %280 = vrot.lane.b32.xlu0 %v1781_v29, %s1733_s27 }
 0x3e1   :  { %284 = vrot.lane.b32.xlu0 %v1787_v31, %s1733_s27 }
 0x44b   :  { %v437_v26 = vpop.xlane.xlu1 %436 }
 0x44c   :  { %v439_v30 = vsub.f32 %v430_v24, %v437_v26  ;;  %v434_v49 = vpop.xlane.xlu0 %433  ;;  %v1577_v26 = vpack.c.bf16 %v754_v28, %v753_v47 }
 0x44d   :  { %v438_v50 = vsub.f32 %v429_v25, %v434_v49 }
 0x44e   :  { %v442_v32 = vmul.f32 1.442695, %v439_v30 }
 0x44f   :  { %v440_v51 = vmul.f32 1.442695, %v438_v50  ;;  %v275_v52 = vpop.permute.xlu1 %274  ;;  %v755_v50 = vld [vmem:[#allocation2 + $0xb8] sm:$0xff] }
 0x450   :  { %v297_v27 = vmul.f32 %v275_v52, %v1799_v46  ;;  %v273_v53 = vpop.permute.xlu0 %272  ;;  %v742_v52 = vld [vmem:[#allocation2 + $0x88] sm:$0xff] }
 0x451   :  { %1670 = vpow2.f32 %v440_v51  ;;  %v296_v54 = vmul.f32 %v273_v53, %v1801_v48 }
 0x452   :  { %1672 = vpow2.f32 %v442_v32  ;;  %v756_v32 = vld [vmem:[#allocation2 + $0xc0] sm:$0xff] }
 0x453   :  { %v1650_v33 = vpack.i.bf16 %v297_v27, %v296_v54  ;;  %v279_v55 = vpop.permute.xlu1 %278  ;;  %v1581_v51 = vpack.c.bf16 %v756_v32, %v755_v50  ;;  %v743_v27 = vld [vmem:[#allocation2 + $0x90] sm:$0xff]  ;;  %v749_v54 = vshrl.u32 %v28_v16, 7 }
 0x454   :  { %v299_v29 = vmul.f32 %v279_v55, %v1799_v46  ;;  %v277_v56 = vpop.permute.xlu0 %276  ;;  %v1585_v53 = vpack.c.bf16 %v743_v27, %v742_v52 }
 0x455   :  { %v298_v31 = vmul.f32 %v277_v56, %v1801_v48  ;;  %1651 = vrot.lane.b32.xlu0 %v1650_v33, %s1733_s27  ;;  %v1251_v33 = vld [vmem:[#allocation2 + $0x80] ss:$0 sm:$0xff]  ;;  %vm750_vm6 = vcmp.lt.s32.totalorder %v749_v54, 7  ;;  %vm921_vm7 = vcmp.lt.s32.totalorder %v749_v54, 6  ;;  %vm1013_vm8 = vcmp.lt.s32.totalorder %v749_v54, 5 }
 0x456   :  { %v1263_v54 = vld [vmem:[#allocation2 + $0x128] ss:$0 sm:$0xff] }
 0x457   :  { %v1655_v57 = vpack.i.bf16 %v299_v29, %v298_v31  ;;  %v283_v58 = vpop.permute.xlu1 %282 }
 0x458   :  { %v301_v59 = vmul.f32 %v283_v58, %v1799_v46  ;;  %v281_v60 = vpop.permute.xlu0 %280  ;;  %v745_v58 = vld [vmem:[#allocation2 + $0xa0] sm:$0xff] }
 0x459   :  { %v300_v61 = vmul.f32 %v281_v60, %v1801_v48  ;;  %1656 = vrot.lane.b32.xlu1 %v1655_v57, %s1733_s27  ;;  %v744_v57 = vld [vmem:[#allocation2 + $0x98] sm:$0xff] }
 0x45b   :  { %v1671_v62 = vpop.eup %1670  ;;  %v1660_v63 = vpack.i.bf16 %v301_v59, %v300_v61  ;;  %v287_v0 = vpop.permute.xlu1 %286 }
 0x45c   :  { %v1673_v1 = vpop.eup %1672  ;;  %v303_v2 = vmul.f32 %v287_v0, %v1799_v46  ;;  %1407 = vmatprep.mubr.msk.f32.mxu0 %vm431_vm5, %v1671_v62  ;;  %v285_v3 = vpop.permute.xlu0 %284 }
 0x45d   :  { %v302_v4 = vmul.f32 %v285_v3, %v1801_v48  ;;  %1408 = vmatmul.mubr.msk.f32.vlgmr.msra.gmra.mrb[0].mxu0 %vm431_vm5, %v1673_v1  ;;  %1661 = vrot.lane.b32.xlu0 %v1660_v63, %s1733_s27 }
 0x45f   :  { %v1665_v5 = vpack.i.bf16 %v303_v2, %v302_v4 }
 0x461   :  { %1666 = vrot.lane.b32.xlu1 %v1665_v5, %s1733_s27  ;;  %v924_v5 = vld [vmem:[#allocation2 + $0xc8] sm:$0xff] }
 0x462   :  { %v1593_v9 = vpack.c.bf16 %v925_v6, %v924_v5 }
 0x4c7   :  { %v1652_v46 = vpop.permute.xlu0 %1651 }
 0x4c8   :  { %v1654_v12 = vunpack.i.h.bf16 %v1652_v46  ;;  %v1653_v13 = vunpack.i.l.bf16 %v1652_v46  ;;  %v1597_v46 = vpack.c.bf16 %v927_v11, %v926_v10 }
 0x4ca   :  { %v1553_v48 = vpack.c.bf16 %v1654_v12, %v1653_v13  ;;  %v1016_v12 = vld [vmem:[#allocation2 + $0xe8] sm:$0xff]  ;;  %v1017_v13 = vld [vmem:[#allocation2 + $0xf0] sm:$0xff] }
 0x4cb   :  { %v1657_v14 = vpop.permute.xlu1 %1656 }
 0x4cc   :  { %v1659_v15 = vunpack.i.h.bf16 %v1657_v14  ;;  %v1658_v17 = vunpack.i.l.bf16 %v1657_v14  ;;  %1554 = vmatprep.subr.bf16.mxu0 %v1553_v48  ;;  %v1018_v14 = vld [vmem:[#allocation2 + $0xf8] sm:$0xff] }
 0x4cd   :  { %1556 = vmatpush3.bf16.msra.mxu0 %v1553_v48  ;;  %v1601_v48 = vpack.c.bf16 %v1017_v13, %v1016_v12 }
 0x4ce   :  { %v1557_v18 = vpack.c.bf16 %v1659_v15, %v1658_v17  ;;  %v1019_v15 = vld [vmem:[#allocation2 + $0x100] sm:$0xff] }
 0x4cf   :  { %v1662_v20 = vpop.permute.xlu0 %1661  ;;  %v1605_v17 = vpack.c.bf16 %v1019_v15, %v1018_v14 }
 0x4d0   :  { %v1664_v21 = vunpack.i.h.bf16 %v1662_v20  ;;  %v1663_v22 = vunpack.i.l.bf16 %v1662_v20  ;;  %1558 = vmatprep.subr.bf16.mxu0 %v1557_v18  ;;  %v1134_v20 = vld [vmem:[#allocation2 + $0x118] sm:$0xff] }
 0x4d1   :  { %1560 = vmatpush3.bf16.msra.mxu0 %v1557_v18  ;;  %v1133_v18 = vld [vmem:[#allocation2 + $0x110] sm:$0xff] }
 0x4d2   :  { %v1561_v23 = vpack.c.bf16 %v1664_v21, %v1663_v22  ;;  %v1610_v21 = vpack.c.bf16 %v1134_v20, %v1133_v18  ;;  %v1734_v22 = vmov 0.0|0.0  }
 0x4d3   :  { %v1667_v24 = vpop.permute.xlu1 %1666  ;;  %1609 = vmatprep.subr.bf16.mxu1 %v1734_v22 }
 0x4d4   :  { %v1669_v25 = vunpack.i.h.bf16 %v1667_v24  ;;  %v1668_v34 = vunpack.i.l.bf16 %v1667_v24  ;;  %1562 = vmatprep.subr.bf16.mxu0 %v1561_v23  ;;  %v1262_v24 = vld [vmem:[#allocation2 + $0x108] ss:$0 sm:$0xff] }
 0x4d5   :  { %1564 = vmatpush3.bf16.msra.mxu0 %v1561_v23  ;;  %v1135_v23 = vld [vmem:[#allocation2 + $0x120] sm:$0xff] }
 0x4d6   :  { %v1565_v35 = vpack.c.bf16 %v1669_v25, %v1668_v34 }
 0x4d8   :  { %1566 = vmatprep.subr.bf16.mxu0 %v1565_v35 }
 0x4d9   :  { %1568 = vmatpush3.bf16.msra.mxu0 %v1565_v35 }
 0x4da   :  { %1578 = vmatprep.subr.bf16.mxu0 %v1577_v26 }
 0x530   :  { %v1409_v38 = vpop.f32.mrb[0].mxu0 }
 0x531   :  { %v532_v39 = vadd.f32 %v1409_v38, %v453_v36  ;;  %v526_v40 = vpop.f32.mrb[1].mxu0  ;;  %v1113_v36 = vld [vmem:[#allocation2 + $0x1d8] sm:$0xff] }
 0x532   :  { %v527_v41 = vadd.f32 %v526_v40, %v452_v37 }
 0x533   :  { %1674 = vrcp.f32 %v532_v39  ;;  %v1112_v39 = vld [vmem:[#allocation2 + $0x1d0] sm:$0xff] }
 0x534   :  { %1676 = vrcp.f32 %v527_v41 }
 0x53d   :  { %v1675_v42 = vpop.eup %1674 }
 0x53e   :  { %v1677_v43 = vpop.eup %1676  ;;  %v538_v45 = vmul.f32 %v1675_v42, %v1673_v1  ;;  %v1589_v1 = vpack.c.bf16 %v745_v58, %v744_v57 }
 0x53f   :  { %v536_v44 = vmul.f32 %v1677_v43, %v1671_v62 }
 0x541   :  { %1426 = vmatprep.mubr.msk.f32.mxu0 %vm431_vm5, %v536_v44 }
 0x542   :  { %1427 = vmatmul.mubr.msk.f32.vlgmr.msra.gmra.mrb[2].mxu0 %vm431_vm5, %v538_v45 }
 0x543   :  { %1580 = vmatpush3.bf16.msra.mxu0 %v1577_v26 }
 0x544   :  { %1582 = vmatprep.subr.bf16.mxu0 %v1581_v51 }
 0x547   :  { %1584 = vmatpush3.bf16.msra.mxu0 %v1581_v51 }
 0x548   :  { %1586 = vmatprep.subr.bf16.mxu0 %v1585_v53 }
 0x615   :  { %v1428_v30 = vpop.f32.mrb[2].mxu0 }
 0x616   :  { %v643_v49 = vpop.f32.mrb[3].mxu0 }
 0x617   :  { %1437 = vmatprep.mubr.msk.f32.mxu1 %vm142_vm3, %v643_v49 }
 0x618   :  { %1438 = vmatmul.mubr.msk.f32.vlgmr.msra.gmra.mrb[6].mxu1 %vm142_vm3, %v1428_v30 }
 0x619   :  { %1611 = vmatpush3.bf16.msra.mxu1 %v1610_v21  ;;  %1490 = vmatprep.mubr.msk.f32.mxu1 %vm1735_vm9, %v1730_v19 }
 0x61a   :  { %1488 = vmatprep.subr.mxu1 %v1730_v19 }
 0x61d   :  { %1489 = vmatpush3.msra.mxu1 %v1135_v23 }
 0x6eb   :  { %v1439_v55 = vpop.f32.mrb[6].mxu1 }
 0x6ec   :  { %v739_v29 = vadd.f32 %v1439_v55, %v1251_v33  ;;  %v733_v56 = vpop.f32.mrb[7].mxu1 }
 0x6ed   :  { %v734_v31 = vadd.f32 %v1251_v33, %v733_v56 }
 0x6ee   :  { %v747_v59 = vrot.slane %v739_v29, 1  ;;  %v920_v60 = vrot.slane %v739_v29, 2  ;;  %v1012_v61 = vrot.slane %v739_v29, 3 }
 0x6ef   :  { %v746_v62 = vrot.slane %v734_v31, 1  ;;  %v919_v63 = vrot.slane %v734_v31, 2  ;;  %v1011_v0 = vrot.slane %v734_v31, 3 }
 0x6f1   :  { %v751_v2 = vsel %vm750_vm6, %v746_v62, %v747_v59  ;;  %v752_v3 = vsel %vm750_vm6, %v747_v59, %v746_v62  ;;  %v922_v16 = vsel %vm921_vm7, %v919_v63, %v920_v60  ;;  %v923_v4 = vsel %vm921_vm7, %v920_v60, %v919_v63 }
 0x6f2   :  { %1448 = vmatprep.mubr.msk.f32.mxu0 %vm142_vm3, %v751_v2  ;;  %v1014_v7 = vsel %vm1013_vm8, %v1011_v0, %v1012_v61  ;;  %v1015_v8 = vsel %vm1013_vm8, %v1012_v61, %v1011_v0 }
 0x6f3   :  { %1449 = vmatmul.mubr.msk.f32.vlgmr.msra.gmra.mrb[4].mxu0 %vm142_vm3, %v752_v3 }
 0x6f4   :  { %1588 = vmatpush3.bf16.msra.mxu0 %v1585_v53  ;;  %1459 = vmatprep.mubr.msk.f32.mxu0 %vm142_vm3, %v734_v31 }
 0x6f5   :  { %1590 = vmatprep.subr.bf16.mxu0 %v1589_v1 }
 0x6f8   :  { %1592 = vmatpush3.bf16.msra.mxu0 %v1589_v1 }
 0x6f9   :  { %1594 = vmatprep.subr.bf16.mxu0 %v1593_v9 }
 0x6fb   :  { %1460 = vmatmul.mubr.msk.f32.vlgmr.msra.gmra.mrb[4].mxu0 %vm142_vm3, %v739_v29 }
 0x6fc   :  { %1596 = vmatpush3.bf16.msra.mxu0 %v1593_v9  ;;  %1470 = vmatprep.mubr.msk.f32.mxu0 %vm142_vm3, %v922_v16 }
 0x6fd   :  { %1598 = vmatprep.subr.bf16.mxu0 %v1597_v46 }
 0x700   :  { %1600 = vmatpush3.bf16.msra.mxu0 %v1597_v46 }
 0x701   :  { %1602 = vmatprep.subr.bf16.mxu0 %v1601_v48 }
 0x703   :  { %1471 = vmatmul.mubr.msk.f32.vlgmr.msra.gmra.mrb[4].mxu0 %vm142_vm3, %v923_v4 }
 0x704   :  { %1604 = vmatpush3.bf16.msra.mxu0 %v1601_v48  ;;  %1481 = vmatprep.mubr.msk.f32.mxu0 %vm142_vm3, %v1014_v7 }
 0x705   :  { %1606 = vmatprep.subr.bf16.mxu0 %v1605_v17 }
 0x708   :  { %1608 = vmatpush3.bf16.msra.mxu0 %v1605_v17 }
 0x70b   :  { %1482 = vmatmul.mubr.msk.f32.vlgmr.msra.gmra.mrb[4].mxu0 %vm142_vm3, %v1015_v8 }
 0x7de   :  { %v1483_v25 = vpop.f32.mrb[4].mxu0 }
 0x7df   :  { %v1109_v34 = vadd.f32 %v1483_v25, %v1262_v24  ;;  %v1092_v35 = vpop.f32.mrb[5].mxu0 }
 0x7e0   :  { %v1108_v37 = vadd.f32 %v1262_v24, %v1092_v35 }
 0x7e1   :  { %v1111_v38 = vmax.f32 %v1109_v34, 0.0 }
 0x7e2   :  { %v1110_v40 = vmax.f32 %v1108_v37, 0.0 }
 0x7e3   :  { %v1115_v41 = vmul.f32 %v1113_v36, %v1111_v38 }
 0x7e4   :  { %v1114_v42 = vmul.f32 %v1112_v39, %v1110_v40 }
 0x7e5   :  { %v1124_v43 = vsel %vm1116_vm10, %v1115_v41, -inf }
 0x7e6   :  { %v1125_v44 = vrot.slane %v1124_v43, 4  ;;  %v1117_v45 = vsel %vm1116_vm10, %v1114_v42, -inf }
 0x7e7   :  { %v1118_v47 = vrot.slane %v1117_v45, 4 }
 0x7e8   :  { %v1126_v19 = vmax.f32 %v1124_v43, %v1125_v44 }
 0x7e9   :  { %v1119_v28 = vmax.f32 %v1117_v45, %v1118_v47 }
 0x7ea   :  { %v1127_v26 = vrot.slane %v1126_v19, 2 }
 0x7eb   :  { %v1120_v30 = vrot.slane %v1119_v28, 2 }
 0x7ec   :  { %v1128_v49 = vmax.f32 %v1126_v19, %v1127_v26 }
 0x7ed   :  { %v1121_v50 = vmax.f32 %v1119_v28, %v1120_v30 }
 0x7ee   :  { %v1129_v32 = vrot.slane %v1128_v49, 1 }
 0x7ef   :  { %v1122_v51 = vrot.slane %v1121_v50, 1 }
 0x7f0   :  { %v1130_v52 = vmax.f32 %v1128_v49, %v1129_v32 }
 0x7f1   :  { %v1123_v27 = vmax.f32 %v1121_v50, %v1122_v51 }
 0x7f3   :  { %v1132_v53 = vsel %vm1131_vm11, %v1123_v27, %v1130_v52 }
 0x7f4   :  { %1491 = vmatmul.mubr.msk.f32.vlgmr.msra.gmra.mrb[8].mxu1 %vm1116_vm10, %v1132_v53 }
 0x8c7   :  { %v1210_v33 = vpop.f32.mrb[8].mxu1 }
 0x8c8   :  { %v1211_v55 = vadd.f32 %v1263_v54, %v1210_v33  ;;  %v1492_v29 = vpop.f32.mrb[9].mxu1 }
 0x8ca   :  { %1214 = vst [vmem:[#allocation5] sm:$0x3] %v1211_v55 }
 0x8cb   :  { %1711 = shalt.err (!%p1708_p12)
}
 0x8cc   :  { %s1712_s5 = scalar_lea.hbm %s1901_s2, 32 }
 0x8cd   :  { %p1713_p13 = scmp.ne.s32.totalorder %s1901_s2, %s1712_s5  ;;  %p1716_p0 = scmp.lt.u32.totalorder %s1712_s5, %s1901_s2 }
 0x8cf   :  { %p1718_p1 = pnand %p1716_p0, %p1713_p13 }
 0x8d1   :  { %1721 = shalt.err (!%p1718_p1)
}
 0x8d2   :  { %1224 = dma.vmem_to_hbm [thread:$0]  %s1222_s29, 32, %s1901_s2, [#allocation4]  }
 0x8d3   :  { %1724 = dma.done.wait [#allocation4], 32  }
 0x8d4   :  { %1725 = vsyncadd [#allocation4], 4294967264 }
 0x8d5   :  { %1228 = vsyncpa [#allocation3], 1 }
 0x8d6   :  { %1229 = vsyncpa [#allocation4], 1 }

</bundles_post_ra>
